<compile_context>
chip_gen: v5e
topology: v5e:2x2
jax: 0.10.0
libtpu: 0.0.40
codegen_flags: <defaults>
</compile_context>

<pallas_src>
import functools

import jax
import jax.numpy as jnp
from jax.experimental import pallas as pl
from jax.experimental.pallas import tpu as pltpu

HIDDEN = 128
LANE = 128


def policy_kernel(x_ref, w1_ref, b1_ref, w2_ref, b2_ref, out_ref, *, a_dim):
    # x: [TB, S] f32 (cast to bf16 in VMEM), w1: [S, 128] bf16, b1: [1, 128] f32,
    # w2: [128, A_pad] bf16, b2: [1, A_pad] f32 (-1e9 in padded cols),
    # out: [TB, A] f32.
    x = x_ref[...].astype(jnp.bfloat16)
    h = jnp.dot(x, w1_ref[...], preferred_element_type=jnp.float32) + b1_ref[...]
    h = jnp.maximum(h, 0.0)                                   # ReLU, f32 [TB, 128]
    logits = jnp.dot(h.astype(jnp.bfloat16), w2_ref[...],
                     preferred_element_type=jnp.float32) + b2_ref[...]  # [TB, A_pad]
    m = jnp.max(logits, axis=-1, keepdims=True)
    e = jnp.exp(logits - m)                                   # padded cols -> exp(-1e9-m)=0
    denom = jnp.sum(e, axis=-1, keepdims=True)
    probs = e / denom                                         # exact normalization
    out_ref[...] = probs[:, :a_dim].astype(out_ref.dtype)     # narrow store, only A cols


def _round_up(x, m):
    return ((x + m - 1) // m) * m


@functools.partial(jax.jit, static_argnames=("block_b",))
def policy_forward(state, w1, b1, w2, b2, *, block_b=4096):
    """state: [B, state_dim] f32. w1: [state_dim, 128], b1: [1,128],
    w2: [128, action_dim], b2: [1, action_dim]. Returns [B, action_dim] probs (f32)."""
    B, S = state.shape
    H = w1.shape[1]
    A = w2.shape[1]

    # Lane-dense compute: pad action dim up to a multiple of 128 (weights only;
    # the stored output stays A columns wide).
    A_pad = pl.cdiv(A, LANE) * LANE
    w2p = jnp.zeros((H, A_pad), jnp.float32).at[:, :A].set(w2)
    # Large finite negative (NOT -inf) in padded bias, kept in f32 -> padded probs = 0.
    b2p = jnp.full((1, A_pad), -1e9, jnp.float32).at[:, :A].set(b2)

    # Batch tile: multiple of 8 sublanes; large enough to amortize per-step
    # overhead, but capped so the grid has >= 2 steps when B > 8 (v7x megacore).
    tb = min(block_b, _round_up(B, 8))
    if B > 8:
        tb = min(tb, _round_up((B + 1) // 2, 8))
    tb = max(8, (tb // 8) * 8)

    w1_bf16 = w1.astype(jnp.bfloat16)
    w2_bf16 = w2p.astype(jnp.bfloat16)
    b1_f32 = b1.astype(jnp.float32)

    grid = (pl.cdiv(B, tb),)   # partial last block handled by the pipeline
    out = pl.pallas_call(
        functools.partial(policy_kernel, a_dim=A),
        out_shape=jax.ShapeDtypeStruct((B, A), jnp.float32),
        grid=grid,
        in_specs=[
            pl.BlockSpec((tb, S), lambda i: (i, 0)),       # state tile (pipelined, f32)
            pl.BlockSpec((S, H), lambda i: (0, 0)),        # w1: resident across grid
            pl.BlockSpec((1, H), lambda i: (0, 0)),        # b1
            pl.BlockSpec((H, A_pad), lambda i: (0, 0)),    # w2 (lane-padded)
            pl.BlockSpec((1, A_pad), lambda i: (0, 0)),    # b2 (lane-padded, f32)
        ],
        out_specs=pl.BlockSpec((tb, A), lambda i: (i, 0)), # narrow output block
        compiler_params=pltpu.CompilerParams(
            dimension_semantics=("parallel",)),            # 2x on v7x megacore
    )(state, w1_bf16, b1_f32, w2_bf16, b2p)

    return out


def init_params(key, state_dim, action_dim, hidden=HIDDEN):
    # Deterministic synthetic init mimicking nn.Linear's uniform(-1/sqrt(fan_in), +)
    k1, k2, k3, k4 = jax.random.split(key, 4)
    lim1 = 1.0 / jnp.sqrt(state_dim)
    lim2 = 1.0 / jnp.sqrt(hidden)
    w1 = jax.random.uniform(k1, (state_dim, hidden), jnp.float32, -lim1, lim1)
    b1 = jax.random.uniform(k2, (1, hidden), jnp.float32, -lim1, lim1)
    w2 = jax.random.uniform(k3, (hidden, action_dim), jnp.float32, -lim2, lim2)
    b2 = jax.random.uniform(k4, (1, action_dim), jnp.float32, -lim2, lim2)
    return w1, b1, w2, b2


def _reference(state, w1, b1, w2, b2):
    h = jnp.maximum(state @ w1 + b1, 0.0)
    return jax.nn.softmax(h @ w2 + b2, axis=-1)


if __name__ == "__main__":
    key = jax.random.PRNGKey(0)
    k_state, k_params, k_big = jax.random.split(key, 3)

    B, STATE_DIM, ACTION_DIM = 2, 16, 8
    state = jax.random.normal(k_state, (B, STATE_DIM), jnp.float32)
    w1, b1, w2, b2 = init_params(k_params, STATE_DIM, ACTION_DIM)

    probs = policy_forward(state, w1, b1, w2, b2)
    probs = jax.block_until_ready(probs)

    ref = _reference(state, w1, b1, w2, b2)
    assert probs.shape == (B, ACTION_DIM)
    # bf16 matmul inputs -> relaxed tolerance vs f32 reference
    assert jnp.allclose(probs, ref, atol=2e-2, rtol=2e-2)
    # exact f32 softmax division -> tight normalization
    assert jnp.allclose(jnp.sum(probs, axis=-1), 1.0, atol=1e-5)

    # Exercise multiple grid steps + a partial last block with a small tile.
    B2 = 200
    state2 = jax.random.normal(k_big, (B2, STATE_DIM), jnp.float32)
    probs2 = jax.block_until_ready(
        policy_forward(state2, w1, b1, w2, b2, block_b=64))
    ref2 = _reference(state2, w1, b1, w2, b2)
    assert probs2.shape == (B2, ACTION_DIM)
    assert jnp.allclose(probs2, ref2, atol=2e-2, rtol=2e-2)
    assert jnp.allclose(jnp.sum(probs2, axis=-1), 1.0, atol=1e-5)

    print("KERNEL_OK")
</pallas_src>

<mosaic_0001>
module attributes {stable_mosaic.version = 11 : i64} {
  func.func @policy_kernel(%arg0: i32, %arg1: memref<8x16xf32, #tpu.memory_space<vmem>>, %arg2: memref<16x128xbf16, #tpu.memory_space<vmem>>, %arg3: memref<1x128xf32, #tpu.memory_space<vmem>>, %arg4: memref<128x128xbf16, #tpu.memory_space<vmem>>, %arg5: memref<1x128xf32, #tpu.memory_space<vmem>>, %arg6: memref<8x8xf32, #tpu.memory_space<vmem>>) attributes {dimension_semantics = [#tpu.dimension_semantics<parallel>], iteration_bounds = array<i64: 1>, scalar_prefetch = 0 : i64, scratch_operands = 0 : i64, tpu.core_type = #tpu.core_type<tc>, window_params = [{transform_indices = @transform_0, window_bounds = array<i64: 8, 16>}, {pipeline_mode = #tpu.pipeline_mode<synchronous>, transform_indices = @transform_1, window_bounds = array<i64: 16, 128>}, {pipeline_mode = #tpu.pipeline_mode<synchronous>, transform_indices = @transform_2, window_bounds = array<i64: 1, 128>}, {pipeline_mode = #tpu.pipeline_mode<synchronous>, transform_indices = @transform_3, window_bounds = array<i64: 128, 128>}, {pipeline_mode = #tpu.pipeline_mode<synchronous>, transform_indices = @transform_4, window_bounds = array<i64: 1, 128>}, {transform_indices = @transform_5, window_bounds = array<i64: 8, 8>}]} {
    %c0 = arith.constant 0 : index
    %c0_0 = arith.constant 0 : index
    %0 = vector.load %arg1[%c0, %c0_0] : memref<8x16xf32, #tpu.memory_space<vmem>>, vector<8x16xf32>
    %1 = arith.truncf %0 : vector<8x16xf32> to vector<8x16xbf16>
    %c0_1 = arith.constant 0 : index
    %c0_2 = arith.constant 0 : index
    %2 = vector.load %arg2[%c0_1, %c0_2] : memref<16x128xbf16, #tpu.memory_space<vmem>>, vector<16x128xbf16>
    %cst = arith.constant dense<0.000000e+00> : vector<8x128xf32>
    %3 = tpu.matmul %1, %2, %cst {dimension_numbers = #tpu.dot_dimension_numbers<[1], [0], [0], [1], [0, 0, 1, 1], [], []>} : vector<8x16xbf16>, vector<16x128xbf16>, vector<8x128xf32> -> vector<8x128xf32>
    %c0_3 = arith.constant 0 : index
    %c0_4 = arith.constant 0 : index
    %4 = vector.load %arg3[%c0_3, %c0_4] : memref<1x128xf32, #tpu.memory_space<vmem>>, vector<1x128xf32>
    %5 = vector.broadcast %4 : vector<1x128xf32> to vector<8x128xf32>
    %6 = arith.addf %3, %5 : vector<8x128xf32>
    %cst_5 = arith.constant 0.000000e+00 : f32
    %7 = vector.broadcast %cst_5 : f32 to vector<8x128xf32>
    %8 = arith.maximumf %6, %7 : vector<8x128xf32>
    %9 = arith.truncf %8 : vector<8x128xf32> to vector<8x128xbf16>
    %c0_6 = arith.constant 0 : index
    %c0_7 = arith.constant 0 : index
    %10 = vector.load %arg4[%c0_6, %c0_7] : memref<128x128xbf16, #tpu.memory_space<vmem>>, vector<128x128xbf16>
    %cst_8 = arith.constant dense<0.000000e+00> : vector<8x128xf32>
    %11 = tpu.matmul %9, %10, %cst_8 {dimension_numbers = #tpu.dot_dimension_numbers<[1], [0], [0], [1], [0, 0, 1, 1], [], []>} : vector<8x128xbf16>, vector<128x128xbf16>, vector<8x128xf32> -> vector<8x128xf32>
    %c0_9 = arith.constant 0 : index
    %c0_10 = arith.constant 0 : index
    %12 = vector.load %arg5[%c0_9, %c0_10] : memref<1x128xf32, #tpu.memory_space<vmem>>, vector<1x128xf32>
    %13 = vector.broadcast %12 : vector<1x128xf32> to vector<8x128xf32>
    %14 = arith.addf %11, %13 : vector<8x128xf32>
    %cst_11 = arith.constant dense<0xFF800000> : vector<8xf32>
    %15 = vector.multi_reduction <maximumf>, %14, %cst_11 [1] : vector<8x128xf32> to vector<8xf32>
    %16 = vector.shape_cast %15 : vector<8xf32> to vector<8x1xf32>
    %17 = vector.broadcast %16 : vector<8x1xf32> to vector<8x128xf32>
    %18 = arith.subf %14, %17 : vector<8x128xf32>
    %19 = math.exp %18 : vector<8x128xf32>
    %cst_12 = arith.constant dense<0.000000e+00> : vector<8xf32>
    %20 = vector.multi_reduction <add>, %19, %cst_12 [1] : vector<8x128xf32> to vector<8xf32>
    %21 = vector.shape_cast %20 : vector<8xf32> to vector<8x1xf32>
    %22 = vector.broadcast %21 : vector<8x1xf32> to vector<8x128xf32>
    %23 = arith.divf %19, %22 : vector<8x128xf32>
    %24 = vector.extract_strided_slice %23 {offsets = [0, 0], sizes = [8, 8], strides = [1, 1]} : vector<8x128xf32> to vector<8x8xf32>
    %c0_13 = arith.constant 0 : index
    %c0_14 = arith.constant 0 : index
    %25 = vector.load %arg6[%c0_13, %c0_14] : memref<8x8xf32, #tpu.memory_space<vmem>>, vector<8x8xf32>
    tpu.vector_store %arg6[%c0_13, %c0_14], %24 {strides = array<i32>} : memref<8x8xf32, #tpu.memory_space<vmem>>, vector<8x8xf32>,
    return
  }
  func.func @transform_0(%arg0: i32) -> (i32, i32) {
    %c0_i32 = arith.constant 0 : i32
    %c0_i32_0 = arith.constant 0 : i32
    return %arg0, %c0_i32 : i32, i32
  }
  func.func @transform_1(%arg0: i32) -> (i32, i32) {
    %c0_i32 = arith.constant 0 : i32
    %c0_i32_0 = arith.constant 0 : i32
    %c0_i32_1 = arith.constant 0 : i32
    return %c0_i32, %c0_i32_0 : i32, i32
  }
  func.func @transform_2(%arg0: i32) -> (i32, i32) {
    %c0_i32 = arith.constant 0 : i32
    %c0_i32_0 = arith.constant 0 : i32
    %c0_i32_1 = arith.constant 0 : i32
    return %c0_i32, %c0_i32_0 : i32, i32
  }
  func.func @transform_3(%arg0: i32) -> (i32, i32) {
    %c0_i32 = arith.constant 0 : i32
    %c0_i32_0 = arith.constant 0 : i32
    %c0_i32_1 = arith.constant 0 : i32
    return %c0_i32, %c0_i32_0 : i32, i32
  }
  func.func @transform_4(%arg0: i32) -> (i32, i32) {
    %c0_i32 = arith.constant 0 : i32
    %c0_i32_0 = arith.constant 0 : i32
    %c0_i32_1 = arith.constant 0 : i32
    return %c0_i32, %c0_i32_0 : i32, i32
  }
  func.func @transform_5(%arg0: i32) -> (i32, i32) {
    %c0_i32 = arith.constant 0 : i32
    %c0_i32_0 = arith.constant 0 : i32
    return %arg0, %c0_i32 : i32, i32
  }
}

</mosaic_0001>

<bundles_post_ra>
// kernel: policy_forward.1
= control target key start
LH: loop header
LB: loop body
LE: loop exit
PB: predicated region body
PF: predicated region fallthrough
CT: control target
= control target key end

     0   :  { %10 = vsyncpa [#allocation3], 0  ;;  %vm36_vm0 = vcmask 130048   ;;  %vm158_vm5 = vcmask 64512   ;;  %s331_s0 = inlined_call_operand.vmem [shape: f32[2,16], index: 0, kind: input, shape index: {}]   ;;  %s332_s1 = inlined_call_operand.vmem [shape: bf16[16,128], index: 1, kind: input, shape index: {}]   ;;  %s333_s2 = inlined_call_operand.vmem [shape: f32[1,128], index: 2, kind: input, shape index: {}]   ;;  %s334_s3 = inlined_call_operand.vmem [shape: bf16[128,128], index: 3, kind: input, shape index: {}]   ;;  %s335_s4 = inlined_call_operand.vmem [shape: f32[1,128], index: 4, kind: input, shape index: {}]   ;;  %s336_s5 = inlined_call_operand.hbm [shape: f32[2,8], index: 5, kind: output, shape index: {}]  }
   0x1   :  { %v215_v0 = vld [vmem:[%s332_s1] sm:$0xff]  ;;  %v223_v3 = vld [vmem:[%s334_s3 + $0x38] sm:$0xff]  ;;  %v222_v4 = vld [vmem:[%s334_s3 + $0x30] sm:$0xff] }
   0x2   :  { %v22_v1 = vld [vmem:[%s331_s0] sm:$0xff]  ;;  %47 = vmatpush.bf16.msra.mxu0 %v215_v0  ;;  %123 = vmatpush.bf16.msra.mxu1 %v223_v3  ;;  %v221_v5 = vld [vmem:[%s334_s3 + $0x28] sm:$0xff]  ;;  %v219_v7 = vld [vmem:[%s334_s3 + $0x18] sm:$0xff] }
   0x3   :  { %v23_v2 = vpack.c.bf16 %v22_v1, %v22_v1  ;;  %v220_v6 = vld [vmem:[%s334_s3 + $0x20] sm:$0xff]  ;;  %v218_v8 = vld [vmem:[%s334_s3 + $0x10] sm:$0xff]  ;;  %v217_v9 = vld [vmem:[%s334_s3 + $0x8] sm:$0xff] }
   0x4   :  { %v216_v10 = vld [vmem:[%s334_s3] sm:$0xff] }
   0x5   :  { %182 = vmatmul.msk.bf16.vlgmr.msra.gmra.mxu0 %vm36_vm0, %v23_v2  ;;  %v227_v11 = vld [vmem:[%s333_s2] ss:$0 sm:$0xff] }
   0x6   :  { %124 = vmatpush.bf16.msra.mxu1 %v222_v4  ;;  %v228_v17 = vld [vmem:[%s335_s4] ss:$0 sm:$0xff] }
   0xa   :  { %125 = vmatpush.bf16.msra.mxu1 %v221_v5 }
   0xe   :  { %126 = vmatpush.bf16.msra.mxu1 %v220_v6 }
  0x12   :  { %127 = vmatpush.bf16.msra.mxu1 %v219_v7 }
  0x16   :  { %128 = vmatpush.bf16.msra.mxu1 %v218_v8 }
  0x1a   :  { %129 = vmatpush.bf16.msra.mxu1 %v217_v9 }
  0x1e   :  { %130 = vmatpush.bf16.msra.mxu1 %v216_v10 }
  0x82   :  { %v49_v12 = vpop.f32.mrf.mxu0 }
  0x83   :  { %v50_v13 = vadd.f32 %v227_v11, %v49_v12 }
  0x85   :  { %v53_v14 = vmax.f32 %v50_v13, 0.0 }
  0x87   :  { %v54_v15 = vpack.c.bf16 %v53_v14, %v53_v14 }
  0x89   :  { %131 = vmatmul.bf16.vlgmr.msra.gmra.mxu1 %v54_v15 }
  0x8a   :  { %v51_v16 = vpop.f32.mrf.mxu0 }
 0x106   :  { %v132_v18 = vpop.f32.mrf.mxu1 }
 0x107   :  { %v133_v19 = vadd.f32 %v228_v17, %v132_v18 }
 0x109   :  { %136 = vmax.xlane.f32.xlu0 %v133_v19 }
 0x10e   :  { %v134_v20 = vpop.f32.mrf.mxu1 }
 0x17c   :  { %v137_v21 = vpop.xlane.xlu0 %136 }
 0x17d   :  { %v138_v22 = vsub.f32 %v133_v19, %v137_v21 }
 0x17f   :  { %v139_v23 = vmul.f32 1.442695, %v138_v22 }
 0x181   :  { %229 = vpow2.f32 %v139_v23 }
 0x187   :  { %v230_v24 = vpop.eup %229 }
 0x188   :  { %141 = vadd.xlane.f32.xlu0 %v230_v24 }
 0x1fb   :  { %v142_v25 = vpop.xlane.xlu0 %141 }
 0x1fc   :  { %231 = vrcp.f32 %v142_v25  ;;  %v154_v29 = vand.u32 2147483648, %v142_v25  ;;  %v152_v31 = vand.u32 2147483647, %v142_v25  ;;  %vm148_vm2 = vweird.f32 %v142_v25 }
 0x1fe   :  { %v155_v33 = vor.u32 1.1754944e-38, %v154_v29  ;;  %vm153_vm4 = vcmp.eq.f32.partialorder %v152_v31, 8.507059e+37 }
 0x202   :  { %v232_v26 = vpop.eup %231 }
 0x203   :  { %v144_v27 = vmul.f32 %v232_v26, %v142_v25  ;;  %vm149_vm1 = vweird.f32 %v232_v26 }
 0x204   :  { %vm150_vm3 = vmor %vm148_vm2, %vm149_vm1 }
 0x205   :  { %v145_v28 = vsub.f32 1.0, %v144_v27 }
 0x207   :  { %v146_v30 = vmul.f32 %v232_v26, %v145_v28 }
 0x209   :  { %v147_v32 = vadd.f32 %v232_v26, %v146_v30 }
 0x20b   :  { %v151_v34 = vsel %vm150_vm3, %v232_v26, %v147_v32 }
 0x20c   :  { %v156_v35 = vsel %vm153_vm4, %v155_v33, %v151_v34 }
 0x20d   :  { %v157_v36 = vmul.f32 %v230_v24, %v156_v35 }
 0x20f   :  { %159 = vst.msk [vmem:[#allocation2] sm:$0xff] %vm158_vm5, %v157_v36 }
 0x210   :  { %163 = vsyncadd [#allocation3], 96  ;;  %s166_s4 = sshll.u32 %s336_s5, 4  ;;  %s259_s15 = smov [#allocation2]   ;;  %s167_s4 = int_to_ptr.hbm [resolvable:$true] %s166_s4 }
 0x211   :  { %s164_s16 = sshll.u32 %s259_s15, 4  ;;  %s260_s17 = smov 32   ;;  %s165_s16 = int_to_ptr.vmem [resolvable:$true] %s164_s16 }
 0x212   :  { %s261_s18 = smov 2  }
 0x213   :  { %172 = dma.vmem_to_hbm [thread:$0]  %s165_s16, 32, %s167_s4, [#allocation3], %s260_s17, %s260_s17, %s261_s18  }
 0x214   :  { %257 = dma.done.wait [#allocation3], 128  }
 0x215   :  { %258 = vsyncadd [#allocation3], 4294967168 }
 0x216   :  { %177 = vsyncpa [#allocation3], 1 }

</bundles_post_ra>
